<compile_context>
chip_gen: v7x
topology: tpu7x:2x2x1
jax: 0.10.0
libtpu: 0.0.40
codegen_flags: <defaults>
</compile_context>

<pallas_src>
import math
import functools

import jax
import jax.numpy as jnp
from jax.experimental import pallas as pl
from jax.experimental.pallas import tpu as pltpu


def _add_pe_kernel(x_ref, pe_ref, o_ref):
    # x_ref : (1, tS, D)  tile of x[b, s*tS:(s+1)*tS, :]   (x stays batch-first in HBM)
    # pe_ref: (tS, 1, D)  tile of pe[s*tS:(s+1)*tS]
    # o_ref : (tS, D)     tile of the (S, B*D) output at rows s*tS.., cols b*D..
    o_ref[...] = (x_ref[0] + pe_ref[:, 0, :]).astype(o_ref.dtype)


def build_pe(max_len, d_model, dtype=jnp.float32):
    """Deterministic pe buffer, shape (max_len, 1, d_model) == register_buffer('pe')."""
    position = jnp.arange(max_len, dtype=jnp.float32)[:, None]                # (L, 1)
    div_term = jnp.exp(jnp.arange(0, d_model, 2, dtype=jnp.float32)
                       * (-math.log(10000.0) / d_model))                      # (D/2,)
    ang = position * div_term                                                 # (L, D/2)
    pe = jnp.zeros((max_len, d_model), dtype=jnp.float32)
    pe = pe.at[:, 0::2].set(jnp.sin(ang))
    pe = pe.at[:, 1::2].set(jnp.cos(ang))
    return pe[:, None, :].astype(dtype)                                       # (L, 1, D)


def _choose_block_s(S, D, itemsize, target_block_bytes=2 * 1024 * 1024):
    """Pick the S-tile so each (tS, D) block is ~<= 2 MiB: with 3 operands x 2 pipeline
    buffers that is ~12 MiB live VMEM (fits v7x's 32 MiB scoped default) and is far past
    the tile width needed for ~85%+ of the HBM roofline on v5e/v6e."""
    per_row = max(1, D * itemsize)
    ts = min(S, max(1, target_block_bytes // per_row))
    if ts < S:
        ts = max(8, (ts // 8) * 8)     # sublane-aligned; a partial last tile is masked
        ts = min(ts, S)
    return int(ts)


@functools.partial(jax.jit, static_argnames=("block_s",))
def positional_encoding(x, pe, *, block_s=None):
    """x: (B, S, D), pe: (max_len, 1, D) -> (S, B, D); mirrors PositionalEncoding.forward."""
    B, S, D = x.shape
    pe_s = pe[:S].astype(x.dtype)                         # (S, 1, D), dtype-matched to x
    tS = block_s if block_s is not None else _choose_block_s(S, D, x.dtype.itemsize)
    out2d = pl.pallas_call(
        _add_pe_kernel,
        out_shape=jax.ShapeDtypeStruct((S, B * D), x.dtype),
        grid=(pl.cdiv(S, tS), B),
        in_specs=[
            # fused transpose: x is read straight from HBM in (B, S, D) layout
            pl.BlockSpec((1, tS, D), lambda s, b: (b, s, 0)),
            # pe tile index is constant across the inner b axis -> DMA reused
            pl.BlockSpec((tS, 1, D), lambda s, b: (s, 0, 0)),
        ],
        # lane-dense (full-D) stores; output block lands at rows s*tS.., cols b*D..
        out_specs=pl.BlockSpec((tS, D), lambda s, b: (s, b)),
        compiler_params=pltpu.CompilerParams(
            dimension_semantics=("parallel", "parallel"),  # shard across v7x's 2 TCs
        ),
    )(x, pe_s)
    # contiguous dim-split reshape == bitcast, no extra HBM traffic
    return out2d.reshape(S, B, D)


if __name__ == "__main__":
    key = jax.random.PRNGKey(0)
    MAX_LEN = 64

    # Case 1: small default shapes (single S-tile), lane-dense d_model = 128.
    B, S, D = 2, 8, 128
    pe = build_pe(MAX_LEN, D)
    x = jax.random.normal(key, (B, S, D), dtype=jnp.float32)
    out = jax.block_until_ready(positional_encoding(x, pe))
    ref = jnp.transpose(x, (1, 0, 2)) + pe[:S]
    assert out.shape == (S, B, D), out.shape
    assert out.dtype == x.dtype
    assert jnp.allclose(out, ref, atol=1e-6), float(jnp.max(jnp.abs(out - ref)))

    # Case 2: multi-tile grid with a partial last S-tile (exercises block masking).
    k2 = jax.random.PRNGKey(1)
    B2, S2, D2 = 2, 20, 128
    x2 = jax.random.normal(k2, (B2, S2, D2), dtype=jnp.float32)
    pe2 = build_pe(MAX_LEN, D2)
    out2 = jax.block_until_ready(positional_encoding(x2, pe2, block_s=8))
    ref2 = jnp.transpose(x2, (1, 0, 2)) + pe2[:S2]
    assert out2.shape == (S2, B2, D2)
    assert jnp.allclose(out2, ref2, atol=1e-6), float(jnp.max(jnp.abs(out2 - ref2)))

    # Case 3: bf16 activations (pe dtype-cast in wrapper + explicit store cast).
    xb = x.astype(jnp.bfloat16)
    outb = jax.block_until_ready(positional_encoding(xb, pe))
    refb = (jnp.transpose(x, (1, 0, 2)) + pe[:S]).astype(jnp.bfloat16)
    assert outb.dtype == jnp.bfloat16
    assert jnp.allclose(outb.astype(jnp.float32), refb.astype(jnp.float32), atol=5e-2)

    # TODO(synk): nn.Dropout(0.1) from __init__ is never applied in the torch forward, so omitted.
    print("KERNEL_OK")
</pallas_src>

<mosaic_0001>
module attributes {stable_mosaic.version = 11 : i64} {
  func.func @_add_pe_kernel(%arg0: i32, %arg1: i32, %arg2: memref<1x8x128xf32, #tpu.memory_space<vmem>>, %arg3: memref<8x1x128xf32, #tpu.memory_space<vmem>>, %arg4: memref<8x128xf32, #tpu.memory_space<vmem>>) attributes {dimension_semantics = [#tpu.dimension_semantics<parallel>, #tpu.dimension_semantics<parallel>], iteration_bounds = array<i64: 1, 2>, scalar_prefetch = 0 : i64, scratch_operands = 0 : i64, tpu.core_type = #tpu.core_type<tc>, window_params = [{transform_indices = @transform_0, window_bounds = array<i64: 1, 8, 128>}, {transform_indices = @transform_1, window_bounds = array<i64: 8, 1, 128>}, {transform_indices = @transform_2, window_bounds = array<i64: 8, 128>}]} {
    %c0 = arith.constant 0 : index
    %c0_0 = arith.constant 0 : index
    %c0_1 = arith.constant 0 : index
    %0 = vector.load %arg2[%c0, %c0_0, %c0_1] : memref<1x8x128xf32, #tpu.memory_space<vmem>>, vector<1x8x128xf32>
    %1 = vector.shape_cast %0 : vector<1x8x128xf32> to vector<8x128xf32>
    %c0_2 = arith.constant 0 : index
    %c0_3 = arith.constant 0 : index
    %c0_4 = arith.constant 0 : index
    %2 = vector.load %arg3[%c0_2, %c0_3, %c0_4] : memref<8x1x128xf32, #tpu.memory_space<vmem>>, vector<8x1x128xf32>
    %3 = vector.shape_cast %2 : vector<8x1x128xf32> to vector<8x128xf32>
    %4 = arith.addf %1, %3 : vector<8x128xf32>
    %c0_5 = arith.constant 0 : index
    %c0_6 = arith.constant 0 : index
    %5 = vector.load %arg4[%c0_5, %c0_6] : memref<8x128xf32, #tpu.memory_space<vmem>>, vector<8x128xf32>
    tpu.vector_store %arg4[%c0_5, %c0_6], %4 {strides = array<i32>} : memref<8x128xf32, #tpu.memory_space<vmem>>, vector<8x128xf32>,
    return
  }
  func.func @transform_0(%arg0: i32, %arg1: i32) -> (i32, i32, i32) {
    %c0_i32 = arith.constant 0 : i32
    %c0_i32_0 = arith.constant 0 : i32
    return %arg1, %arg0, %c0_i32 : i32, i32, i32
  }
  func.func @transform_1(%arg0: i32, %arg1: i32) -> (i32, i32, i32) {
    %c0_i32 = arith.constant 0 : i32
    %c0_i32_0 = arith.constant 0 : i32
    %c0_i32_1 = arith.constant 0 : i32
    return %arg0, %c0_i32, %c0_i32_0 : i32, i32, i32
  }
  func.func @transform_2(%arg0: i32, %arg1: i32) -> (i32, i32) {
    %c0_i32 = arith.constant 0 : i32
    return %arg0, %arg1 : i32, i32
  }
}

</mosaic_0001>

<bundles_post_ra>
// kernel: positional_encoding.1
= control target key start
LH: loop header
LB: loop body
LE: loop exit
PB: predicated region body
PF: predicated region fallthrough
CT: control target
= control target key end

     0   :  { %7 = vsyncpa [#allocation3], 0  ;;  %s697_s0 = inlined_call_operand.hbm [shape: f32[2,8,128], index: 0, kind: input, shape index: {}]   ;;  %s698_s1 = inlined_call_operand.vmem [shape: f32[8,1,128], index: 1, kind: input, shape index: {}]   ;;  %s699_s2 = inlined_call_operand.vmem [shape: f32[8,256], index: 2, kind: output, shape index: {}]  }
   0x1   :  { %9 = vsyncpa [#allocation3 + $0x1], 0  ;;  %s541_s9 = smov 0   ;;  %s543_s10 = smov 0  }
   0x2   :  { %s545_s11 = smov 0   ;;  %s547_s12 = smov 0  }
   0x3   :  { %s549_s13 = smov 0   ;;  %s551_s14 = smov 0  }
   0x4 LB: > { %s374_s15 = sadd.s32 4294967295, %s522_s14   ;;  %s24_s16 = sadd.s32 1, %s518_s13  ;;  %s522_s14 = sphi %s551_s14, %s15_s14   ;;  %s518_s13 = sphi %s549_s13, %s709_s13   ;;  %s514_s12 = sphi %s547_s12, %s708_s12   ;;  %s510_s11 = sphi %s545_s11, %s707_s11   ;;  %s506_s10 = sphi %s543_s10, %s706_s10   ;;  %s502_s9 = sphi %s541_s9, %s705_s9  }
   0x5   : > { %p25_p0 = scmp.ge.s32.totalorder %s24_s16, 2  ;;  %s36_s17 = sadd.s32 1, %s510_s11 }
   0x6   : > { %p43_p1 = scmp.ne.s32.totalorder %s510_s11, %s506_s10  ;;  %p44_p2 = scmp.eq.s32.totalorder %s522_s14, 0 }
   0x7   : > { %s711_s16 = smov (%p25_p0, %s24_s16), 0  ;;  %p49_p4 = scmp.ne.s32.totalorder %s506_s10, %s502_s9 }
   0x8   : > { %p577_p3 = por %p44_p2, %p43_p1  ;;  %s31_s19 = ssub.s32 %s518_s13, %s711_s16 }
   0x9   : > { %p50_p5 = scmp.eq.s32.totalorder %s374_s15, 0  ;;  %p34_p6 = scmp.eq.s32.totalorder %s31_s19, 0 }
   0xa   : > { %p392_p8 = scmp.lt.s32.totalorder %s522_s14, 2  ;;  %s135_s22 = sand.u32 1, %s510_s11  }
   0xb   : > { %p584_p7 = por %p50_p5, %p49_p4  ;;  %s380_s23 = sshll.u32 %s518_s13, 7 }
   0xc   : > { %s590_s21 = scalar_select %p34_p6, %s510_s11, %s36_s17  }
   0xd   : > { %s379_s24 = sshll.u32 %s135_s22, 3  ;;  %s597_s27 = scalar_lea.hbm %s697_s0, %s380_s23 }
   0xe   : > { %s139_s28 = scalar_lea.vmem [#allocation2], %s379_s24  ;;  %p601_p9 = pnand %p392_p8, %p577_p3 }
   0xf   : > { %s147_s29 = sshll.u32 %s139_s28, 4  ;;  %s136_s3 = scalar_lea.sflag [#allocation3], %s135_s22  ;;  %s605_s29 = int_to_ptr.vmem [resolvable:$true] %s147_s29 }
  0x10   : > { %s442_s4 = scalar_lea.hbm %s597_s27, 128  ;;  %p444_p13 = pneg %p601_p9 }
  0x11   : > { %p443_p12 = scmp.ne.s32.totalorder %s597_s27, %s442_s4  ;;  %s447_s7 = scalar_lea.hbm %s697_s0, 256 }
  0x12   : > { %p448_p2 = scmp.lt.u32.totalorder %s597_s27, %s697_s0  ;;  %p449_p3 = scmp.lt.u32.totalorder %s447_s7, %s442_s4 }
  0x13   : > { %p445_p0 = pnand %p444_p13, %p443_p12  ;;  %p451_p5 = scmp.lt.u32.totalorder %s442_s4, %s597_s27 }
  0x14   : > { %p450_p4 = por %p449_p3, %p448_p2 }
  0x15   : > { %p446_p1 = pneg %p445_p0 }
  0x16   : > { %p452_p6 = por %p451_p5, %p450_p4 }
  0x18   : > { %p453_p8 = pnand %p452_p6, %p446_p1 }
  0x1a   : > { %456 = shalt.err (!%p453_p8)
}
  0x1b   : > { %s457_s15 = scalar_lea.vmem %s605_s29, 128  ;;  %s524_s17 = smov [#allocation2]  }
  0x1c   : > { %p458_p12 = scmp.ne.s32.totalorder %s605_s29, %s457_s15  ;;  %s462_s18 = sshll.u32 %s524_s17, 4  ;;  %s463_s18 = int_to_ptr.vmem [resolvable:$false] %s462_s18 }
  0x1d   : > { %s464_s19 = scalar_lea.vmem %s463_s18, 256  ;;  %p465_p11 = scmp.lt.s32.totalorder %s605_s29, %s463_s18 }
  0x1e   : > { %p460_p0 = pnand %p458_p12, %p444_p13  ;;  %p466_p2 = scmp.lt.s32.totalorder %s464_s19, %s457_s15 }
  0x20   : > { %p461_p10 = pneg %p460_p0  ;;  %p467_p3 = por %p466_p2, %p465_p11 }
  0x22   : > { %p468_p4 = pnand %p467_p3, %p461_p10 }
  0x24   : > { %471 = shalt.err (!%p468_p4)
}
  0x25   : > { %391 = dma.hbm_to_vmem [thread:$0]  (!%p601_p9), %s597_s27, 128, %s605_s29, %s136_s3  }
  0x26   : > { %p703_p1 = scmp.lt.s32.totalorder %s522_s14, 3  ;;  %p704_p5 = scmp.ge.s32.totalorder %s522_s14, 1 }
  0x28   : > { %p153_p13 = pnand %p704_p5, %p703_p1 }
  0x29   : > { %s158_s22 = sand.u32 (!%p153_p13), 1, %s506_s10  }
  0x2a   : > { %156 = sbr.rel (%p153_p13) target bundleno = 68 (0x44), region = 28  ;;  %s639_s23 = sshll.u32 (!%p153_p13), %s158_s22, 3 }
  0x2b   : > { %s159_s24 = scalar_lea.sflag (!%p153_p13), [#allocation3], %s158_s22  ;;  %s162_s25 = scalar_lea.vmem (!%p153_p13), [#allocation2], %s639_s23 }
  0x31   : > { %497 = dma.done.wait (%p584_p7), %s159_s24, 128  }
  0x32   : > { %499 = vsyncadd (%p584_p7), %s159_s24, 4294967168  ;;  %v227_v0 = vlaneseq  ;;  %v525_v1 = vmov 1966171168   ;;  %p197_p9 = scmp.lt.s32.totalorder %s514_s12, 1  ;;  %v204_v6 = vld [vmem:[%s698_s1] sm:$0x1] }
  0x33   : > { %v225_v2 = vunpack.c.l.s4 %v525_v1  ;;  %v205_v7 = vld [vmem:[%s698_s1 + $0x1] sm:$0x1]  ;;  %v206_v8 = vld [vmem:[%s698_s1 + $0x2] sm:$0x1]  ;;  %v207_v9 = vld [vmem:[%s698_s1 + $0x3] sm:$0x1] }
  0x34   : > { %v228_v3 = vshrl.u32 %v227_v0, 7  ;;  %v208_v10 = vld [vmem:[%s698_s1 + $0x4] sm:$0x1]  ;;  %v220_v11 = vcombine.low %v204_v6, %v205_v7  ;;  %v209_v12 = vld [vmem:[%s698_s1 + $0x5] sm:$0x1]  ;;  %v221_v15 = vcombine.low %v206_v8, %v207_v9  ;;  %s713_s12 = smov (!%p197_p9, %s514_s12), 1 }
  0x35   : > { %v226_v4 = vunpack.c.0.s8 %v225_v2  ;;  %v210_v13 = vld [vmem:[%s698_s1 + $0x6] sm:$0x1]  ;;  %v211_v14 = vld [vmem:[%s698_s1 + $0x7] sm:$0x1]  ;;  %v222_v16 = vcombine.low %v208_v10, %v209_v12  ;;  %s383_s19 = sshll.u32 %s713_s12, 3 }
  0x36   : > { %v223_v17 = vcombine.low %v210_v13, %v211_v14  ;;  %v203_v26 = vld [vmem:[%s162_s25] sm:$0xff]  ;;  %s202_s26 = scalar_lea.vmem %s699_s2, %s383_s19 }
  0x37   : > { %v229_v5 = vsub.s32 %v226_v4, %v228_v3 }
  0x39   : > { %v230_v18 = vrot.slane %v220_v11, %v229_v5  ;;  %v237_v19 = vrot.slane %v221_v15, %v229_v5  ;;  %v244_v20 = vrot.slane %v222_v16, %v229_v5  ;;  %v251_v21 = vrot.slane %v223_v17, %v229_v5 }
  0x3b   : > { %v252_v22 = vcombine.low %v230_v18, %v237_v19  ;;  %v253_v23 = vcombine.low %v244_v20, %v251_v21 }
  0x3d   : > { %v260_v24 = vrot.slane %v252_v22, %v229_v5  ;;  %v267_v25 = vrot.slane %v253_v23, %v229_v5 }
  0x3f   : > { %v268_v27 = vcombine.low %v260_v24, %v267_v25 }
  0x41   : > { %v270_v28 = vadd.f32 %v268_v27, %v203_v26 }
  0x43   : > { %271 = vst [vmem:[%s202_s26] sm:$0xff] %v270_v28 }
  0x44 PF: > { %s15_s14 = sadd.s32 1, %s522_s14   ;;  %s705_s9 = smov %s506_s10 }
  0x45   : > { %p12_p7 = scmp.ge.s32.totalorder %s15_s14, 4   ;;  %s706_s10 = smov %s510_s11 }
  0x46   : > { %s707_s11 = smov %s590_s21  ;;  %s708_s12 = smov %s518_s13 }
  0x47   : > { %s709_s13 = smov %s711_s16  ;;  %14 = sbr.rel (!%p12_p7) target bundleno = 4 (0x4), region = 71 }
  0x4e   :  { %299 = vsyncpa [#allocation3], 1 }
  0x4f   :  { %301 = vsyncpa [#allocation3 + $0x1], 1 }

</bundles_post_ra>
